<compile_context>
chip_gen: v6e
topology: v6e:2x2x1
jax: 0.10.0
libtpu: 0.0.40
codegen_flags: <defaults>
</compile_context>

<pallas_src>
import functools

import numpy as np
import jax
import jax.numpy as jnp
from jax.experimental import pallas as pl
from jax.experimental.pallas import tpu as pltpu


# --------------------------------------------------------------------------- interpolation taps
def _interp_taps(n_out: int, n_in: int):
    """PyTorch nn.UpsamplingBilinear2d (align_corners=True) source taps for one axis."""
    if n_out == 1:
        src = np.zeros((1,), np.float64)
    else:
        src = np.arange(n_out, dtype=np.float64) * (n_in - 1) / (n_out - 1)
    lo = np.clip(np.floor(src).astype(np.int64), 0, n_in - 1)
    hi = np.minimum(lo + 1, n_in - 1)
    t = src - lo
    return lo, hi, t


def _row_interp_matrix(n_out: int, n_in: int) -> np.ndarray:
    """(n_out, n_in) align_corners=True interpolation matrix; every row sums to 1."""
    lo, hi, t = _interp_taps(n_out, n_in)
    m = np.zeros((n_out, n_in), np.float64)
    m[np.arange(n_out), lo] += (1.0 - t)
    m[np.arange(n_out), hi] += t
    return m


def _bilinear_operator(H: int, W: int, Hout: int, Wout: int) -> np.ndarray:
    """Dense fused 2-D bilinear upsample operator:
       up[h*W + w, ho*Wout + wo] = wh[ho, h] * ww[wo, w]; every column sums to 1."""
    wh = _row_interp_matrix(Hout, H)                           # (Hout, H)
    ww = _row_interp_matrix(Wout, W)                           # (Wout, W)
    up = wh.T[:, None, :, None] * ww.T[None, :, None, :]      # (H, W, Hout, Wout)
    return up.reshape(H * W, Hout * Wout).astype(np.float32)


def _pick_row_block(Hout: int, Wout: int, Cout: int, itemsize: int = 4,
                    target_bytes: int = 128 * 1024) -> int:
    """Smallest divisor of Hout giving a lane-dense (multiple-of-128) output block of
    at least ~target_bytes; falls back to the full image."""
    best = Hout
    for r in range(1, Hout + 1):
        if Hout % r:
            continue
        if (r * Wout) % 128 != 0 and r != Hout:
            continue
        best = r
        if r * Wout * Cout * itemsize >= target_bytes:
            break
    return best


# --------------------------------------------------------------------------- fused kernel
def _stage_decoder_kernel(x_ref, wct_ref, b_ref, up_ref, o_ref, z_ref):
    # x_ref  : (1, Cin, H*W)        low-res input, channels on sublanes, spatial on lanes
    # wct_ref: (Cout, Cin)          1x1 conv weight, transposed
    # b_ref  : (Cout, 1)            1x1 conv bias (broadcast along lanes)
    # up_ref : (H*W, rows*Wout)     column block of the fused 2-D bilinear operator
    # o_ref  : (1, Cout, rows*Wout) output row-block, lane-dense stores
    # z_ref  : (Cout, H*W)          VMEM scratch: low-res conv output (persists across row blocks)

    # 1x1 conv (+ bias) at LOW resolution, once per batch element.  Commutes with the
    # bilinear upsample since interpolation rows sum to 1.
    @pl.when(pl.program_id(1) == 0)
    def _():
        z_ref[...] = (jnp.dot(wct_ref[...], x_ref[0],
                              preferred_element_type=jnp.float32) + b_ref[...])

    # Fused height+width bilinear upsample for this output row block: one MXU matmul.
    o_ref[0, :, :] = jnp.dot(z_ref[...], up_ref[...],
                             preferred_element_type=jnp.float32).astype(o_ref.dtype)


# --------------------------------------------------------------------------- wrapper
def stage_decoder_forward(x_nchw, wc, bias, *, scale, out_dtype=jnp.float32):
    """x_nchw: (B, Cin, H, W); wc: (Cin, Cout); bias: (Cout,).
    Returns (B, Cout, H*scale, W*scale) — same NCHW layout as the PyTorch module."""
    B, Cin, H, W = x_nchw.shape
    Cout = wc.shape[1]
    Hout, Wout = H * scale, W * scale
    HW = H * W

    rows = _pick_row_block(Hout, Wout, Cout, itemsize=jnp.dtype(out_dtype).itemsize)
    n_hb = Hout // rows

    # All layout plumbing outside the kernel is free metadata reshapes / tiny constants.
    x_flat = x_nchw.reshape(B, Cin, HW)                         # free reshape
    wct = jnp.transpose(wc, (1, 0))                              # (Cout, Cin), tiny
    bias_col = bias.reshape(Cout, 1)
    up = jnp.asarray(_bilinear_operator(H, W, Hout, Wout))       # (H*W, Hout*Wout)

    out = pl.pallas_call(
        _stage_decoder_kernel,
        out_shape=jax.ShapeDtypeStruct((B, Cout, Hout * Wout), out_dtype),
        grid=(B, n_hb),
        in_specs=[
            pl.BlockSpec((1, Cin, HW), lambda b, hb: (b, 0, 0)),
            pl.BlockSpec((Cout, Cin), lambda b, hb: (0, 0)),
            pl.BlockSpec((Cout, 1), lambda b, hb: (0, 0)),
            pl.BlockSpec((HW, rows * Wout), lambda b, hb: (0, hb)),
        ],
        out_specs=pl.BlockSpec((1, Cout, rows * Wout), lambda b, hb: (b, 0, hb)),
        scratch_shapes=[pltpu.VMEM((Cout, HW), jnp.float32)],
        compiler_params=pltpu.CompilerParams(
            dimension_semantics=("parallel", "arbitrary")),
    )(x_flat, wct, bias_col, up)

    # Free metadata reshape back to NCHW (no HBM transpose).
    return out.reshape(B, Cout, Hout, Wout)


# --------------------------------------------------------------------------- pure-JAX reference
def stage_decoder_reference(x_nchw, wc, bias, *, scale):
    # Literal PyTorch order: bilinear upsample (align_corners=True) then 1x1 conv + bias.
    B, Cin, H, W = x_nchw.shape
    Hout, Wout = H * scale, W * scale
    x = jnp.transpose(x_nchw, (0, 2, 3, 1))                      # NHWC
    lo_y, hi_y, ty = _interp_taps(Hout, H)
    lo_x, hi_x, tx = _interp_taps(Wout, W)
    ty = jnp.asarray(ty, jnp.float32)[None, :, None, None]
    tx = jnp.asarray(tx, jnp.float32)[None, None, :, None]
    top = x[:, lo_y][:, :, lo_x] * (1.0 - tx) + x[:, lo_y][:, :, hi_x] * tx
    bot = x[:, hi_y][:, :, lo_x] * (1.0 - tx) + x[:, hi_y][:, :, hi_x] * tx
    up = top * (1.0 - ty) + bot * ty                             # (B, Hout, Wout, Cin)
    out = jnp.einsum("bhwc,ck->bhwk", up, wc) + bias
    return jnp.transpose(out, (0, 3, 1, 2))


# --------------------------------------------------------------------------- main
if __name__ == "__main__":
    # StageDecoder for stage=2 of the default SegFormerConfig:
    #   in channels  = stage_channels_out[2] = 160
    #   out channels = decoder_out_channels  = 128
    #   scale        = (cumprod(overlap_stride_sizes) // 4)[2] = 4
    # Small spatial size (8x8 -> 32x32) for the test.
    B, Cin, H, W = 2, 160, 8, 8
    Cout, scale = 128, 4

    key = jax.random.PRNGKey(0)
    kx, kw, kb = jax.random.split(key, 3)
    x = jax.random.normal(kx, (B, Cin, H, W), jnp.float32)       # NCHW like PyTorch
    wc = 0.1 * jax.random.normal(kw, (Cin, Cout), jnp.float32)   # Conv2d 1x1 weight (Cin, Cout)
    bias = 0.05 * jax.random.normal(kb, (Cout,), jnp.float32)

    fwd = jax.jit(functools.partial(stage_decoder_forward, scale=scale))
    out = jax.block_until_ready(fwd(x, wc, bias))

    ref = stage_decoder_reference(x, wc, bias, scale=scale)
    assert out.shape == (B, Cout, H * scale, W * scale)
    assert bool(jnp.all(jnp.isfinite(out)))
    max_diff = float(jnp.max(jnp.abs(out - ref)))
    assert max_diff < 1e-3, f"mismatch vs reference: {max_diff}"

    print("KERNEL_OK")
</pallas_src>

<mosaic_0001>
module attributes {stable_mosaic.version = 11 : i64} {
  func.func @_stage_decoder_kernel(%arg0: i32, %arg1: i32, %arg2: memref<1x160x64xf32, #tpu.memory_space<vmem>>, %arg3: memref<128x160xf32, #tpu.memory_space<vmem>>, %arg4: memref<128x1xf32, #tpu.memory_space<vmem>>, %arg5: memref<64x256xf32, #tpu.memory_space<vmem>>, %arg6: memref<1x128x256xf32, #tpu.memory_space<vmem>>, %arg7: memref<128x64xf32, #tpu.memory_space<vmem>>) attributes {dimension_semantics = [#tpu.dimension_semantics<parallel>, #tpu.dimension_semantics<arbitrary>], iteration_bounds = array<i64: 2, 4>, scalar_prefetch = 0 : i64, scratch_operands = 1 : i64, tpu.core_type = #tpu.core_type<tc>, window_params = [{transform_indices = @transform_0, window_bounds = array<i64: 1, 160, 64>}, {pipeline_mode = #tpu.pipeline_mode<synchronous>, transform_indices = @transform_1, window_bounds = array<i64: 128, 160>}, {pipeline_mode = #tpu.pipeline_mode<synchronous>, transform_indices = @transform_2, window_bounds = array<i64: 128, 1>}, {transform_indices = @transform_3, window_bounds = array<i64: 64, 256>}, {transform_indices = @transform_4, window_bounds = array<i64: 1, 128, 256>}]} {
    %c0_i32 = arith.constant 0 : i32
    %0 = arith.cmpi eq, %arg1, %c0_i32 : i32
    %1 = arith.extui %0 : i1 to i32
    %c0_i32_0 = arith.constant 0 : i32
    %2 = arith.cmpi ne, %1, %c0_i32_0 : i32
    scf.if %2 {
      %c0_7 = arith.constant 0 : index
      %c0_8 = arith.constant 0 : index
      %9 = vector.load %arg3[%c0_7, %c0_8] : memref<128x160xf32, #tpu.memory_space<vmem>>, vector<128x160xf32>
      %c0_9 = arith.constant 0 : index
      %c0_10 = arith.constant 0 : index
      %c0_11 = arith.constant 0 : index
      %10 = vector.load %arg2[%c0_9, %c0_10, %c0_11] : memref<1x160x64xf32, #tpu.memory_space<vmem>>, vector<1x160x64xf32>
      %11 = vector.shape_cast %10 : vector<1x160x64xf32> to vector<160x64xf32>
      %cst_12 = arith.constant dense<0.000000e+00> : vector<128x64xf32>
      %12 = tpu.matmul %9, %11, %cst_12 {dimension_numbers = #tpu.dot_dimension_numbers<[1], [0], [0], [1], [0, 0, 1, 1], [], []>} : vector<128x160xf32>, vector<160x64xf32>, vector<128x64xf32> -> vector<128x64xf32>
      %c0_13 = arith.constant 0 : index
      %c0_14 = arith.constant 0 : index
      %13 = vector.load %arg4[%c0_13, %c0_14] : memref<128x1xf32, #tpu.memory_space<vmem>>, vector<128x1xf32>
      %14 = vector.broadcast %13 : vector<128x1xf32> to vector<128x64xf32>
      %15 = arith.addf %12, %14 : vector<128x64xf32>
      %c0_15 = arith.constant 0 : index
      %c0_16 = arith.constant 0 : index
      %16 = vector.load %arg7[%c0_15, %c0_16] : memref<128x64xf32, #tpu.memory_space<vmem>>, vector<128x64xf32>
      tpu.vector_store %arg7[%c0_15, %c0_16], %15 {strides = array<i32>} : memref<128x64xf32, #tpu.memory_space<vmem>>, vector<128x64xf32>,
    } else {
    }
    %c0 = arith.constant 0 : index
    %c0_1 = arith.constant 0 : index
    %3 = vector.load %arg7[%c0, %c0_1] : memref<128x64xf32, #tpu.memory_space<vmem>>, vector<128x64xf32>
    %c0_2 = arith.constant 0 : index
    %c0_3 = arith.constant 0 : index
    %4 = vector.load %arg5[%c0_2, %c0_3] : memref<64x256xf32, #tpu.memory_space<vmem>>, vector<64x256xf32>
    %cst = arith.constant dense<0.000000e+00> : vector<128x256xf32>
    %5 = tpu.matmul %3, %4, %cst {dimension_numbers = #tpu.dot_dimension_numbers<[1], [0], [0], [1], [0, 0, 1, 1], [], []>} : vector<128x64xf32>, vector<64x256xf32>, vector<128x256xf32> -> vector<128x256xf32>
    %c0_4 = arith.constant 0 : index
    %c0_5 = arith.constant 0 : index
    %c0_6 = arith.constant 0 : index
    %6 = vector.load %arg6[%c0_4, %c0_5, %c0_6] : memref<1x128x256xf32, #tpu.memory_space<vmem>>, vector<1x128x256xf32>
    %7 = vector.shape_cast %6 : vector<1x128x256xf32> to vector<128x256xf32>
    %8 = vector.shape_cast %5 : vector<128x256xf32> to vector<1x128x256xf32>
    tpu.vector_store %arg6[%c0_4, %c0_5, %c0_6], %8 {strides = array<i32>} : memref<1x128x256xf32, #tpu.memory_space<vmem>>, vector<1x128x256xf32>,
    return
  }
  func.func @transform_0(%arg0: i32, %arg1: i32) -> (i32, i32, i32) {
    %c0_i32 = arith.constant 0 : i32
    %c0_i32_0 = arith.constant 0 : i32
    %c0_i32_1 = arith.constant 0 : i32
    return %arg0, %c0_i32, %c0_i32_0 : i32, i32, i32
  }
  func.func @transform_1(%arg0: i32, %arg1: i32) -> (i32, i32) {
    %c0_i32 = arith.constant 0 : i32
    %c0_i32_0 = arith.constant 0 : i32
    %c0_i32_1 = arith.constant 0 : i32
    return %c0_i32, %c0_i32_0 : i32, i32
  }
  func.func @transform_2(%arg0: i32, %arg1: i32) -> (i32, i32) {
    %c0_i32 = arith.constant 0 : i32
    %c0_i32_0 = arith.constant 0 : i32
    %c0_i32_1 = arith.constant 0 : i32
    return %c0_i32, %c0_i32_0 : i32, i32
  }
  func.func @transform_3(%arg0: i32, %arg1: i32) -> (i32, i32) {
    %c0_i32 = arith.constant 0 : i32
    %c0_i32_0 = arith.constant 0 : i32
    return %c0_i32, %arg1 : i32, i32
  }
  func.func @transform_4(%arg0: i32, %arg1: i32) -> (i32, i32, i32) {
    %c0_i32 = arith.constant 0 : i32
    %c0_i32_0 = arith.constant 0 : i32
    return %arg0, %c0_i32, %arg1 : i32, i32, i32
  }
}

</mosaic_0001>

<bundles_post_ra>
// kernel: stage_decoder_forward.1
= control target key start
LH: loop header
LB: loop body
LE: loop exit
PB: predicated region body
PF: predicated region fallthrough
CT: control target
= control target key end

     0   :  { %s1374_s15 = smov 0   ;;  %s1376_s16 = smov 0   ;;  %s1891_s0 = inlined_call_operand.vmem [shape: f32[2,160,64], index: 0, kind: input, shape index: {}]   ;;  %s1892_s1 = inlined_call_operand.vmem [shape: f32[128,160], index: 1, kind: input, shape index: {}]   ;;  %s1893_s2 = inlined_call_operand.vmem [shape: f32[128,1], index: 2, kind: input, shape index: {}]   ;;  %s1894_s3 = inlined_call_operand.vmem [shape: f32[64,1024], index: 3, kind: input, shape index: {}]   ;;  %s1895_s4 = inlined_call_operand.vmem [shape: f32[2,128,1024], index: 4, kind: output, shape index: {}]  }
   0x1   :  { %s1378_s17 = smov 0   ;;  %s1380_s18 = smov 0  }
   0x2   :  { %s1382_s19 = smov 0   ;;  %s1384_s20 = smov 0  }
   0x3   :  { %s1386_s21 = smov 0   ;;  %s1388_s22 = smov 0  }
   0x4   :  { %s1390_s23 = smov 0  }
   0x5 LB: > { %s1089_s24 = sadd.s32 4294967295, %s1344_s23   ;;  %s23_s25 = sadd.s32 1, %s1336_s21  ;;  %s1344_s23 = sphi %s1390_s23, %s14_s23   ;;  %s1340_s22 = sphi %s1388_s22, %s1904_s22   ;;  %s1336_s21 = sphi %s1386_s21, %s1903_s21   ;;  %s1332_s20 = sphi %s1384_s20, %s1902_s20   ;;  %s1328_s19 = sphi %s1382_s19, %s1901_s19   ;;  %s1324_s18 = sphi %s1380_s18, %s1900_s18   ;;  %s1320_s17 = sphi %s1378_s17, %s1899_s17   ;;  %s1316_s16 = sphi %s1376_s16, %s1898_s16   ;;  %s1312_s15 = sphi %s1374_s15, %s1897_s15  }
   0x6   : > { %p24_p0 = scmp.ge.s32.totalorder %s23_s25, 4  ;;  %s26_s26 = sadd.s32 1, %s1340_s22 }
   0x7   : > { %s101_s27 = sadd.s32 1, %s1324_s18  ;;  %p108_p1 = scmp.ne.s32.totalorder %s1324_s18, %s1320_s17 }
   0x8   : > { %s1906_s25 = smov (%p24_p0, %s23_s25), 0  ;;  %s1908_s26 = smov (!%p24_p0, %s26_s26), %s1340_s22 }
   0x9   : > { %s98_s28 = ssub.s32 %s1336_s21, %s1906_s25  ;;  %p109_p2 = scmp.eq.s32.totalorder %s1344_s23, 0 }
   0xa   : > { %p28_p3 = scmp.ge.s32.totalorder %s1908_s26, 2  ;;  %p99_p4 = scmp.eq.s32.totalorder %s98_s28, 0 }
   0xb   : > { %p110_p5 = por %p109_p2, %p108_p1  ;;  %s129_s29 = sadd.s32 1, %s1316_s16 }
   0xc   : > { %s1910_s26 = smov (%p28_p3, %s1908_s26), 0  ;;  %p139_p6 = scmp.ne.s32.totalorder %s1316_s16, %s1312_s15 }
   0xd   : > { %s1435_s30 = scalar_select %p99_p4, %s1324_s18, %s101_s27  }
   0xe   : > { %s124_s5 = ssub.s32 %s1340_s22, %s1910_s26  ;;  %p140_p7 = scmp.eq.s32.totalorder %s1089_s24, 7 }
   0xf   : > { %s126_s6 = sor.u32 %s124_s5, %s98_s28  ;;  %p1092_p10 = scmp.ge.s32.totalorder %s1344_s23, 8 }
  0x10   : > { %p127_p8 = scmp.eq.s32.totalorder %s126_s6, 0  ;;  %p1441_p9 = por %p140_p7, %p139_p6 }
  0x11   : > { %168 = sbr.rel (%p1092_p10) target bundleno = 34 (0x22), region = 24 }
  0x12   : > { %s1446_s8 = scalar_select %p127_p8, %s1316_s16, %s129_s29  }
  0x16   : > { %179 = sbr.rel (!%p110_p5) target bundleno = 34 (0x22), region = 32  ;;  %s181_s9 = sand.u32 (%p110_p5), 1, %s1324_s18  }
  0x17   : > { %s1139_s10 = sshll.u32 (%p110_p5), %s1336_s21, 4  ;;  %s1093_s11 = sshll.u32 (%p110_p5), %s181_s9, 7 }
  0x18   : > { %s1454_s14 = scalar_lea.vmem (%p110_p5), %s1894_s3, %s1139_s10  ;;  %s183_s24 = scalar_lea.vmem (%p110_p5), [#allocation3], %s1093_s11 }
  0x19   : > { %v199_v0 = vld [vmem:[%s1454_s14] sm:$0xff] (%p110_p5)  ;;  %v201_v1 = vld [vmem:[%s1454_s14 + $0x8] sm:$0xff] (%p110_p5) }
  0x1a   : > { %v203_v2 = vld [vmem:[%s1454_s14 + $0x40] sm:$0xff] (%p110_p5)  ;;  %200 = vst [vmem:[%s183_s24] sm:$0xff] (%p110_p5), %v199_v0  ;;  %202 = vst [vmem:[%s183_s24 + $0x8] sm:$0xff] (%p110_p5), %v201_v1  ;;  %v205_v3 = vld [vmem:[%s1454_s14 + $0x48] sm:$0xff] (%p110_p5) }
  0x1b   : > { %204 = vst [vmem:[%s183_s24 + $0x10] sm:$0xff] %v203_v2  ;;  %v207_v4 = vld [vmem:[%s1454_s14 + $0x80] sm:$0xff]  ;;  %v209_v5 = vld [vmem:[%s1454_s14 + $0x88] sm:$0xff]  ;;  %206 = vst [vmem:[%s183_s24 + $0x18] sm:$0xff] %v205_v3 }
  0x1c   : > { %208 = vst [vmem:[%s183_s24 + $0x20] sm:$0xff] %v207_v4  ;;  %210 = vst [vmem:[%s183_s24 + $0x28] sm:$0xff] %v209_v5  ;;  %v211_v6 = vld [vmem:[%s1454_s14 + $0xc0] sm:$0xff]  ;;  %v213_v7 = vld [vmem:[%s1454_s14 + $0xc8] sm:$0xff] }
  0x1d   : > { %v215_v8 = vld [vmem:[%s1454_s14 + $0x100] sm:$0xff]  ;;  %212 = vst [vmem:[%s183_s24 + $0x30] sm:$0xff] %v211_v6  ;;  %214 = vst [vmem:[%s183_s24 + $0x38] sm:$0xff] %v213_v7  ;;  %v217_v9 = vld [vmem:[%s1454_s14 + $0x108] sm:$0xff] }
  0x1e   : > { %216 = vst [vmem:[%s183_s24 + $0x40] sm:$0xff] %v215_v8  ;;  %v219_v10 = vld [vmem:[%s1454_s14 + $0x140] sm:$0xff]  ;;  %v221_v11 = vld [vmem:[%s1454_s14 + $0x148] sm:$0xff]  ;;  %218 = vst [vmem:[%s183_s24 + $0x48] sm:$0xff] %v217_v9 }
  0x1f   : > { %220 = vst [vmem:[%s183_s24 + $0x50] sm:$0xff] %v219_v10  ;;  %222 = vst [vmem:[%s183_s24 + $0x58] sm:$0xff] %v221_v11  ;;  %v223_v12 = vld [vmem:[%s1454_s14 + $0x180] sm:$0xff]  ;;  %v225_v13 = vld [vmem:[%s1454_s14 + $0x188] sm:$0xff] }
  0x20   : > { %v227_v14 = vld [vmem:[%s1454_s14 + $0x1c0] sm:$0xff]  ;;  %224 = vst [vmem:[%s183_s24 + $0x60] sm:$0xff] %v223_v12  ;;  %226 = vst [vmem:[%s183_s24 + $0x68] sm:$0xff] %v225_v13  ;;  %v229_v15 = vld [vmem:[%s1454_s14 + $0x1c8] sm:$0xff] }
  0x21   : > { %228 = vst [vmem:[%s183_s24 + $0x70] sm:$0xff] %v227_v14  ;;  %230 = vst [vmem:[%s183_s24 + $0x78] sm:$0xff] %v229_v15 }
  0x22 PF: > { %p1096_p11 = scmp.ge.s32.totalorder %s1344_s23, 1  ;;  %p235_p12 = scmp.lt.s32.totalorder %s1344_s23, 9 }
  0x24   : > { %p236_p13 = pnand %p1096_p11, %p235_p12 }
  0x25   : > { %s242_s27 = sand.u32 (!%p236_p13), 1, %s1320_s17   ;;  %s268_s28 = sand.u32 (!%p236_p13), 1, %s1312_s15  }
  0x26   : > { %239 = sbr.rel (%p236_p13) target bundleno = 566 (0x236), region = 55  ;;  %s1097_s29 = sshll.u32 (!%p236_p13), %s242_s27, 7 }
  0x27   : > { %s1098_s5 = sshll.u32 (!%p236_p13), %s268_s28, 8  ;;  %p271_p0 = scmp.lt.s32.totalorder (!%p236_p13), %s1332_s20, 1 }
  0x28   : > { %s1483_s13 = scalar_lea.vmem (!%p236_p13), [#allocation3], %s1097_s29  ;;  %s1485_s14 = scalar_lea.vmem (!%p236_p13), [#allocation4], %s1098_s5 }
  0x29   : > { %p1100_p1 = scmp.ne.s32.totalorder (!%p236_p13), %s1328_s19, 0 }
  0x2b   : > { %s272_s6 = scalar_select %p271_p0, %s1332_s20, 1 }
  0x2c   : > { %281 = sbr.rel (%p1100_p1) target bundleno = 315 (0x13b), region = 63 }
  0x2d   : > { %s1196_s9 = smul.u32 160, %s272_s6 }
  0x2f   : > { %s1481_s12 = scalar_lea.vmem %s1891_s0, %s1196_s9 }
  0x31   : > { %v329_v16 = vld [vmem:[%s1481_s12 + $0x78] sm:$0xff]  ;;  %v1346_v17 = vmov 0.0   ;;  %v328_v18 = vld [vmem:[%s1481_s12 + $0x70] sm:$0xff]  ;;  %v327_v19 = vld [vmem:[%s1481_s12 + $0x68] sm:$0xff]  ;;  %vm430_vm0 = vcmask 261120   ;;  %v1347_v49 = vmov 0  }
  0x32   : > { %479 = vmatprep.subr.mxu0 %v1346_v17  ;;  %1140 = vmatprep.subr.mxu1 %v1346_v17  ;;  %v326_v20 = vld [vmem:[%s1481_s12 + $0x60] sm:$0xff]  ;;  %v325_v21 = vld [vmem:[%s1481_s12 + $0x58] sm:$0xff]  ;;  %v324_v22 = vld [vmem:[%s1481_s12 + $0x50] sm:$0xff]  ;;  %vm624_vm1 = vcmask 523264  }
  0x33   : > { %480 = vmatpush1.msra.mxu0 %v329_v16  ;;  %1160 = vmatpush1.msra.mxu1 %v329_v16  ;;  %v323_v23 = vld [vmem:[%s1481_s12 + $0x48] sm:$0xff]  ;;  %v322_v24 = vld [vmem:[%s1481_s12 + $0x40] sm:$0xff]  ;;  %v321_v25 = vld [vmem:[%s1481_s12 + $0x38] sm:$0xff] }
  0x34   : > { %481 = vmatprep.subr.mxu0 %v1346_v17  ;;  %1141 = vmatprep.subr.mxu1 %v1346_v17  ;;  %v320_v26 = vld [vmem:[%s1481_s12 + $0x30] sm:$0xff]  ;;  %v319_v27 = vld [vmem:[%s1481_s12 + $0x28] sm:$0xff]  ;;  %v318_v28 = vld [vmem:[%s1481_s12 + $0x20] sm:$0xff] }
  0x35   : > { %482 = vmatpush1.msra.mxu0 %v328_v18  ;;  %1161 = vmatpush1.msra.mxu1 %v328_v18  ;;  %v317_v29 = vld [vmem:[%s1481_s12 + $0x18] sm:$0xff]  ;;  %v316_v30 = vld [vmem:[%s1481_s12 + $0x10] sm:$0xff]  ;;  %v315_v31 = vld [vmem:[%s1481_s12 + $0x8] sm:$0xff] }
  0x36   : > { %483 = vmatprep.subr.mxu0 %v1346_v17  ;;  %1142 = vmatprep.subr.mxu1 %v1346_v17  ;;  %v314_v32 = vld [vmem:[%s1481_s12] sm:$0xff]  ;;  %v333_v33 = vld [vmem:[%s1481_s12 + $0x98] sm:$0xff]  ;;  %v332_v34 = vld [vmem:[%s1481_s12 + $0x90] sm:$0xff] }
  0x37   : > { %484 = vmatpush1.msra.mxu0 %v327_v19  ;;  %1162 = vmatpush1.msra.mxu1 %v327_v19  ;;  %v331_v35 = vld [vmem:[%s1481_s12 + $0x88] sm:$0xff]  ;;  %v330_v36 = vld [vmem:[%s1481_s12 + $0x80] sm:$0xff]  ;;  %v285_v41 = vld [vmem:[%s1892_s1 + $0x18] sm:$0xff] }
  0x38   : > { %485 = vmatprep.subr.mxu0 %v1346_v17  ;;  %1143 = vmatprep.subr.mxu1 %v1346_v17  ;;  %v283_v37 = vld [vmem:[%s1892_s1 + $0x8] sm:$0xff]  ;;  %v282_v39 = vld [vmem:[%s1892_s1] sm:$0xff]  ;;  %v301_v42 = vld [vmem:[%s1892_s1 + $0x98] sm:$0xff] }
  0x39   : > { %486 = vmatpush1.msra.mxu0 %v326_v20  ;;  %1163 = vmatpush1.msra.mxu1 %v326_v20  ;;  %v299_v38 = vld [vmem:[%s1892_s1 + $0x88] sm:$0xff]  ;;  %v298_v40 = vld [vmem:[%s1892_s1 + $0x80] sm:$0xff]  ;;  %v336_v43 = vld [vmem:[%s1893_s2 + $0x10] sm:$0xff] }
  0x3a   : > { %487 = vmatprep.subr.mxu0 %v1346_v17  ;;  %1144 = vmatprep.subr.mxu1 %v1346_v17  ;;  %v334_v44 = vld [vmem:[%s1893_s2] sm:$0xff]  ;;  %v284_v45 = vld [vmem:[%s1892_s1 + $0x10] sm:$0xff]  ;;  %v287_v47 = vld [vmem:[%s1892_s1 + $0x28] sm:$0xff] }
  0x3b   : > { %488 = vmatpush1.msra.mxu0 %v325_v21  ;;  %1164 = vmatpush1.msra.mxu1 %v325_v21  ;;  %v300_v46 = vld [vmem:[%s1892_s1 + $0x90] sm:$0xff]  ;;  %v303_v48 = vld [vmem:[%s1892_s1 + $0xa8] sm:$0xff]  ;;  %v337_v50 = vld [vmem:[%s1893_s2 + $0x18] sm:$0xff] }
  0x3c   : > { %489 = vmatprep.subr.mxu0 %v1346_v17  ;;  %1145 = vmatprep.subr.mxu1 %v1346_v17  ;;  %v335_v51 = vld [vmem:[%s1893_s2 + $0x8] sm:$0xff]  ;;  %v286_v52 = vld [vmem:[%s1892_s1 + $0x20] sm:$0xff]  ;;  %v289_v54 = vld [vmem:[%s1892_s1 + $0x38] sm:$0xff] }
  0x3d   : > { %490 = vmatpush1.msra.mxu0 %v324_v22  ;;  %1165 = vmatpush1.msra.mxu1 %v324_v22  ;;  %v302_v53 = vld [vmem:[%s1892_s1 + $0xa0] sm:$0xff]  ;;  %v305_v55 = vld [vmem:[%s1892_s1 + $0xb8] sm:$0xff]  ;;  %v339_v56 = vld [vmem:[%s1893_s2 + $0x28] sm:$0xff] }
  0x3e   : > { %491 = vmatprep.subr.mxu0 %v1346_v17  ;;  %1146 = vmatprep.subr.mxu1 %v1346_v17  ;;  %v338_v57 = vld [vmem:[%s1893_s2 + $0x20] sm:$0xff]  ;;  %v288_v58 = vld [vmem:[%s1892_s1 + $0x30] sm:$0xff]  ;;  %v291_v60 = vld [vmem:[%s1892_s1 + $0x48] sm:$0xff] }
  0x3f   : > { %492 = vmatpush1.msra.mxu0 %v323_v23  ;;  %1166 = vmatpush1.msra.mxu1 %v323_v23  ;;  %v304_v59 = vld [vmem:[%s1892_s1 + $0xb0] sm:$0xff]  ;;  %v307_v61 = vld [vmem:[%s1892_s1 + $0xc8] sm:$0xff]  ;;  %v341_v62 = vld [vmem:[%s1893_s2 + $0x38] sm:$0xff] }
  0x40   : > { %493 = vmatprep.subr.mxu0 %v1346_v17  ;;  %1147 = vmatprep.subr.mxu1 %v1346_v17  ;;  %v340_v63 = vld [vmem:[%s1893_s2 + $0x30] sm:$0xff]  ;;  %v290_v0 = vld [vmem:[%s1892_s1 + $0x40] sm:$0xff]  ;;  %v293_v2 = vld [vmem:[%s1892_s1 + $0x58] sm:$0xff] }
  0x41   : > { %494 = vmatpush1.msra.mxu0 %v322_v24  ;;  %1167 = vmatpush1.msra.mxu1 %v322_v24  ;;  %v306_v1 = vld [vmem:[%s1892_s1 + $0xc0] sm:$0xff]  ;;  %v309_v3 = vld [vmem:[%s1892_s1 + $0xd8] sm:$0xff]  ;;  %v343_v4 = vld [vmem:[%s1893_s2 + $0x48] sm:$0xff] }
  0x42   : > { %495 = vmatprep.subr.mxu0 %v1346_v17  ;;  %1148 = vmatprep.subr.mxu1 %v1346_v17  ;;  %v342_v5 = vld [vmem:[%s1893_s2 + $0x40] sm:$0xff]  ;;  %v292_v6 = vld [vmem:[%s1892_s1 + $0x50] sm:$0xff]  ;;  %v295_v8 = vld [vmem:[%s1892_s1 + $0x68] sm:$0xff] }
  0x43   : > { %496 = vmatpush1.msra.mxu0 %v321_v25  ;;  %1168 = vmatpush1.msra.mxu1 %v321_v25  ;;  %v308_v7 = vld [vmem:[%s1892_s1 + $0xd0] sm:$0xff]  ;;  %v311_v9 = vld [vmem:[%s1892_s1 + $0xe8] sm:$0xff]  ;;  %v345_v10 = vld [vmem:[%s1893_s2 + $0x58] sm:$0xff] }
  0x44   : > { %497 = vmatprep.subr.mxu0 %v1346_v17  ;;  %1149 = vmatprep.subr.mxu1 %v1346_v17  ;;  %v344_v11 = vld [vmem:[%s1893_s2 + $0x50] sm:$0xff]  ;;  %v294_v12 = vld [vmem:[%s1892_s1 + $0x60] sm:$0xff]  ;;  %v297_v14 = vld [vmem:[%s1892_s1 + $0x78] sm:$0xff] }
  0x45   : > { %498 = vmatpush1.msra.mxu0 %v320_v26  ;;  %1169 = vmatpush1.msra.mxu1 %v320_v26  ;;  %v310_v13 = vld [vmem:[%s1892_s1 + $0xe0] sm:$0xff]  ;;  %v313_v15 = vld [vmem:[%s1892_s1 + $0xf8] sm:$0xff]  ;;  %v347_v16 = vld [vmem:[%s1893_s2 + $0x68] sm:$0xff] }
  0x46   : > { %499 = vmatprep.subr.mxu0 %v1346_v17  ;;  %1150 = vmatprep.subr.mxu1 %v1346_v17  ;;  %v296_v18 = vld [vmem:[%s1892_s1 + $0x70] sm:$0xff]  ;;  %v349_v20 = vld [vmem:[%s1893_s2 + $0x78] sm:$0xff] }
  0x47   : > { %500 = vmatpush1.msra.mxu0 %v319_v27  ;;  %1170 = vmatpush1.msra.mxu1 %v319_v27  ;;  %v312_v19 = vld [vmem:[%s1892_s1 + $0xf0] sm:$0xff] }
  0x48   : > { %501 = vmatprep.subr.mxu0 %v1346_v17  ;;  %1151 = vmatprep.subr.mxu1 %v1346_v17  ;;  %v348_v21 = vld [vmem:[%s1893_s2 + $0x70] sm:$0xff] }
  0x49   : > { %502 = vmatpush1.msra.mxu0 %v318_v28  ;;  %1171 = vmatpush1.msra.mxu1 %v318_v28 }
  0x4a   : > { %503 = vmatprep.subr.mxu0 %v1346_v17  ;;  %1152 = vmatprep.subr.mxu1 %v1346_v17 }
  0x4b   : > { %504 = vmatpush1.msra.mxu0 %v317_v29  ;;  %1172 = vmatpush1.msra.mxu1 %v317_v29 }
  0x4c   : > { %505 = vmatprep.subr.mxu0 %v1346_v17  ;;  %1153 = vmatprep.subr.mxu1 %v1346_v17 }
  0x4d   : > { %506 = vmatpush1.msra.mxu0 %v316_v30  ;;  %1173 = vmatpush1.msra.mxu1 %v316_v30 }
  0x4e   : > { %507 = vmatprep.subr.mxu0 %v1346_v17  ;;  %1154 = vmatprep.subr.mxu1 %v1346_v17 }
  0x4f   : > { %508 = vmatpush1.msra.mxu0 %v315_v31  ;;  %1174 = vmatpush1.msra.mxu1 %v315_v31 }
  0x50   : > { %509 = vmatprep.subr.mxu0 %v1346_v17  ;;  %1155 = vmatprep.subr.mxu1 %v1346_v17 }
  0x51   : > { %510 = vmatpush1.msra.mxu0 %v314_v32  ;;  %1175 = vmatpush1.msra.mxu1 %v314_v32 }
  0x52   : > { %535 = vmatprep.subr.mxu0 %v1346_v17  ;;  %1156 = vmatprep.subr.mxu1 %v1346_v17 }
  0x53   : > { %536 = vmatpush2.msra.mxu0 %v333_v33  ;;  %1176 = vmatpush2.msra.mxu1 %v333_v33 }
  0x54   : > { %537 = vmatprep.subr.mxu0 %v1346_v17  ;;  %1157 = vmatprep.subr.mxu1 %v1346_v17 }
  0x55   : > { %538 = vmatpush2.msra.mxu0 %v332_v34  ;;  %1177 = vmatpush2.msra.mxu1 %v332_v34 }
  0x56   : > { %539 = vmatprep.subr.mxu0 %v1346_v17  ;;  %1158 = vmatprep.subr.mxu1 %v1346_v17 }
  0x57   : > { %540 = vmatpush2.msra.mxu0 %v331_v35  ;;  %1178 = vmatpush2.msra.mxu1 %v331_v35 }
  0x58   : > { %541 = vmatprep.subr.mxu0 %v1346_v17  ;;  %1159 = vmatprep.subr.mxu1 %v1346_v17  ;;  %v346_v17 = vld [vmem:[%s1893_s2 + $0x60] sm:$0xff] }
  0x59   : > { %542 = vmatpush2.msra.mxu0 %v330_v36  ;;  %1179 = vmatpush2.msra.mxu1 %v330_v36 }
  0x5a   : > { %1101 = vmatprep.mubr.msk.f32.mxu0 %vm430_vm0, %v283_v37  ;;  %1109 = vmatprep.mubr.msk.f32.mxu1 %vm430_vm0, %v299_v38 }
  0x5b   : > { %544 = vmatmul.mubr.f32.vlgmr.msra.gmra.mxu0 %v282_v39  ;;  %584 = vmatmul.mubr.f32.vlgmr.msra.gmra.mxu1 %v298_v40 }
  0x5c   : > { %1102 = vmatprep.mubr.msk.f32.mxu0 %vm430_vm0, %v285_v41  ;;  %1110 = vmatprep.mubr.msk.f32.mxu1 %vm430_vm0, %v301_v42 }
  0x5d   : > { %1273 = vset.pattern.permute.xlu1 %v1347_v49  ;;  %1272 = vset.pattern.permute.xlu0 %v1347_v49 }
  0x5e   : > { %362 = vperm.xlu1 %1273, %v336_v43   ;;  %352 = vperm.xlu0 %1272, %v334_v44  }
  0x5f   : > { %549 = vmatmul.mubr.f32.gmra.mxu0 %v284_v45  ;;  %589 = vmatmul.mubr.f32.gmra.mxu1 %v300_v46 }
  0x60   : > { %1103 = vmatprep.mubr.msk.f32.mxu0 %vm430_vm0, %v287_v47  ;;  %1111 = vmatprep.mubr.msk.f32.mxu1 %vm430_vm0, %v303_v48 }
  0x62   : > { %367 = vperm.xlu1 %1273, %v337_v50   ;;  %357 = vperm.xlu0 %1272, %v335_v51  }
  0x63   : > { %554 = vmatmul.mubr.f32.gmra.mxu0 %v286_v52  ;;  %594 = vmatmul.mubr.f32.gmra.mxu1 %v302_v53 }
  0x64   : > { %1104 = vmatprep.mubr.msk.f32.mxu0 %vm430_vm0, %v289_v54  ;;  %1112 = vmatprep.mubr.msk.f32.mxu1 %vm430_vm0, %v305_v55 }
  0x66   : > { %377 = vperm.xlu1 %1273, %v339_v56   ;;  %372 = vperm.xlu0 %1272, %v338_v57  }
  0x67   : > { %559 = vmatmul.mubr.f32.gmra.mxu0 %v288_v58  ;;  %599 = vmatmul.mubr.f32.gmra.mxu1 %v304_v59 }
  0x68   : > { %1105 = vmatprep.mubr.msk.f32.mxu0 %vm430_vm0, %v291_v60  ;;  %1113 = vmatprep.mubr.msk.f32.mxu1 %vm430_vm0, %v307_v61 }
  0x6a   : > { %387 = vperm.xlu1 %1273, %v341_v62   ;;  %382 = vperm.xlu0 %1272, %v340_v63  }
  0x6b   : > { %564 = vmatmul.mubr.f32.gmra.mxu0 %v290_v0  ;;  %604 = vmatmul.mubr.f32.gmra.mxu1 %v306_v1 }
  0x6c   : > { %1106 = vmatprep.mubr.msk.f32.mxu0 %vm430_vm0, %v293_v2  ;;  %1114 = vmatprep.mubr.msk.f32.mxu1 %vm430_vm0, %v309_v3 }
  0x6e   : > { %397 = vperm.xlu1 %1273, %v343_v4   ;;  %392 = vperm.xlu0 %1272, %v342_v5  }
  0x6f   : > { %569 = vmatmul.mubr.f32.gmra.mxu0 %v292_v6  ;;  %609 = vmatmul.mubr.f32.gmra.mxu1 %v308_v7 }
  0x70   : > { %1107 = vmatprep.mubr.msk.f32.mxu0 %vm430_vm0, %v295_v8  ;;  %1115 = vmatprep.mubr.msk.f32.mxu1 %vm430_vm0, %v311_v9 }
  0x72   : > { %407 = vperm.xlu1 %1273, %v345_v10   ;;  %402 = vperm.xlu0 %1272, %v344_v11  }
  0x73   : > { %574 = vmatmul.mubr.f32.gmra.mxu0 %v294_v12  ;;  %614 = vmatmul.mubr.f32.gmra.mxu1 %v310_v13 }
  0x74   : > { %1108 = vmatprep.mubr.msk.f32.mxu0 %vm430_vm0, %v297_v14  ;;  %1116 = vmatprep.mubr.msk.f32.mxu1 %vm430_vm0, %v313_v15 }
  0x76   : > { %417 = vperm.xlu1 %1273, %v347_v16   ;;  %412 = vperm.xlu0 %1272, %v346_v17  }
  0x77   : > { %579 = vmatmul.mubr.f32.gmra.mxu0 %v296_v18  ;;  %619 = vmatmul.mubr.f32.gmra.mxu1 %v312_v19 }
  0x7a   : > { %427 = vperm.xlu1 %1273, %v349_v20   ;;  %422 = vperm.xlu0 %1272, %v348_v21  }
  0xd9   : > { %v353_v22 = vpop.permute.xlu0 %352  ;;  %v363_v23 = vpop.permute.xlu1 %362 }
  0xdd   : > { %v358_v24 = vpop.permute.xlu0 %357  ;;  %v368_v25 = vpop.permute.xlu1 %367 }
  0xe1   : > { %v373_v26 = vpop.permute.xlu0 %372  ;;  %v378_v27 = vpop.permute.xlu1 %377 }
  0xe5   : > { %v383_v28 = vpop.permute.xlu0 %382  ;;  %v1708_v29 = vpop.permute.xlu1 %387 }
  0xe9   : > { %v393_v30 = vpop.permute.xlu0 %392  ;;  %v398_v37 = vpop.permute.xlu1 %397 }
  0xed   : > { %v403_v44 = vpop.permute.xlu0 %402  ;;  %v408_v51 = vpop.permute.xlu1 %407 }
  0xf1   : > { %v413_v58 = vpop.permute.xlu0 %412  ;;  %v418_v1 = vpop.permute.xlu1 %417 }
  0xf5   : > { %v423_v8 = vpop.permute.xlu0 %422  ;;  %v428_v15 = vpop.permute.xlu1 %427 }
 0x11b   : > { %v545_v31 = vpop.f32.mrf.mxu0  ;;  %v585_v32 = vpop.f32.mrf.mxu1 }
 0x11c   : > { %v546_v33 = vadd.f32 %v545_v31, %v353_v22  ;;  %v586_v34 = vadd.f32 %v585_v32, %v393_v30 }
 0x11d   : > { %v547_v35 = vpop.f32.mrf.mxu0  ;;  %v587_v36 = vpop.f32.mrf.mxu1 }
 0x11e   : > { %625 = vst.msk [vmem:[#allocation2] sm:$0xff] %vm624_vm1, %v546_v33  ;;  %633 = vst.msk [vmem:[#allocation2 + $0x40] sm:$0xff] %vm624_vm1, %v586_v34 }
 0x11f   : > { %v550_v38 = vpop.f32.mrf.mxu0  ;;  %v590_v39 = vpop.f32.mrf.mxu1 }
 0x120   : > { %v551_v40 = vadd.f32 %v550_v38, %v358_v24  ;;  %v591_v41 = vadd.f32 %v590_v39, %v398_v37 }
 0x121   : > { %v552_v42 = vpop.f32.mrf.mxu0  ;;  %v592_v43 = vpop.f32.mrf.mxu1 }
 0x122   : > { %626 = vst.msk [vmem:[#allocation2 + $0x8] sm:$0xff] %vm624_vm1, %v551_v40  ;;  %634 = vst.msk [vmem:[#allocation2 + $0x48] sm:$0xff] %vm624_vm1, %v591_v41 }
 0x123   : > { %v555_v45 = vpop.f32.mrf.mxu0  ;;  %v595_v46 = vpop.f32.mrf.mxu1 }
 0x124   : > { %v556_v47 = vadd.f32 %v555_v45, %v363_v23  ;;  %v596_v48 = vadd.f32 %v595_v46, %v403_v44 }
 0x125   : > { %v557_v49 = vpop.f32.mrf.mxu0  ;;  %v597_v50 = vpop.f32.mrf.mxu1 }
 0x126   : > { %627 = vst.msk [vmem:[#allocation2 + $0x10] sm:$0xff] %vm624_vm1, %v556_v47  ;;  %635 = vst.msk [vmem:[#allocation2 + $0x50] sm:$0xff] %vm624_vm1, %v596_v48 }
 0x127   : > { %v560_v52 = vpop.f32.mrf.mxu0  ;;  %v600_v53 = vpop.f32.mrf.mxu1 }
 0x128   : > { %v561_v54 = vadd.f32 %v560_v52, %v368_v25  ;;  %v601_v55 = vadd.f32 %v600_v53, %v408_v51 }
 0x129   : > { %v562_v56 = vpop.f32.mrf.mxu0  ;;  %v602_v57 = vpop.f32.mrf.mxu1 }
 0x12a   : > { %628 = vst.msk [vmem:[#allocation2 + $0x18] sm:$0xff] %vm624_vm1, %v561_v54  ;;  %636 = vst.msk [vmem:[#allocation2 + $0x58] sm:$0xff] %vm624_vm1, %v601_v55 }
 0x12b   : > { %v565_v59 = vpop.f32.mrf.mxu0  ;;  %v605_v60 = vpop.f32.mrf.mxu1 }
 0x12c   : > { %v566_v61 = vadd.f32 %v565_v59, %v373_v26  ;;  %v606_v62 = vadd.f32 %v605_v60, %v413_v58 }
 0x12d   : > { %v567_v63 = vpop.f32.mrf.mxu0  ;;  %v607_v0 = vpop.f32.mrf.mxu1 }
 0x12e   : > { %629 = vst.msk [vmem:[#allocation2 + $0x20] sm:$0xff] %vm624_vm1, %v566_v61  ;;  %637 = vst.msk [vmem:[#allocation2 + $0x60] sm:$0xff] %vm624_vm1, %v606_v62 }
 0x12f   : > { %v570_v2 = vpop.f32.mrf.mxu0  ;;  %v610_v3 = vpop.f32.mrf.mxu1 }
 0x130   : > { %v571_v4 = vadd.f32 %v570_v2, %v378_v27  ;;  %v611_v5 = vadd.f32 %v610_v3, %v418_v1 }
 0x131   : > { %v572_v6 = vpop.f32.mrf.mxu0  ;;  %v612_v7 = vpop.f32.mrf.mxu1 }
 0x132   : > { %630 = vst.msk [vmem:[#allocation2 + $0x28] sm:$0xff] %vm624_vm1, %v571_v4  ;;  %638 = vst.msk [vmem:[#allocation2 + $0x68] sm:$0xff] %vm624_vm1, %v611_v5 }
 0x133   : > { %v575_v9 = vpop.f32.mrf.mxu0  ;;  %v615_v10 = vpop.f32.mrf.mxu1 }
 0x134   : > { %v576_v11 = vadd.f32 %v575_v9, %v383_v28  ;;  %v616_v12 = vadd.f32 %v615_v10, %v423_v8 }
 0x135   : > { %v577_v13 = vpop.f32.mrf.mxu0  ;;  %v617_v14 = vpop.f32.mrf.mxu1 }
 0x136   : > { %631 = vst.msk [vmem:[#allocation2 + $0x30] sm:$0xff] %vm624_vm1, %v576_v11  ;;  %639 = vst.msk [vmem:[#allocation2 + $0x70] sm:$0xff] %vm624_vm1, %v616_v12 }
 0x137   : > { %v580_v16 = vpop.f32.mrf.mxu0  ;;  %v620_v17 = vpop.f32.mrf.mxu1 }
 0x138   : > { %v581_v18 = vadd.f32 %v580_v16, %v1708_v29  ;;  %v621_v19 = vadd.f32 %v620_v17, %v428_v15 }
 0x139   : > { %v582_v20 = vpop.f32.mrf.mxu0  ;;  %v622_v21 = vpop.f32.mrf.mxu1 }
 0x13a   : > { %632 = vst.msk [vmem:[#allocation2 + $0x38] sm:$0xff] %vm624_vm1, %v581_v18  ;;  %640 = vst.msk [vmem:[#allocation2 + $0x78] sm:$0xff] %vm624_vm1, %v621_v19 }
 0x13b PF: > { %v672_v22 = vld [vmem:[%s1483_s13 + $0x78] sm:$0xff]  ;;  %v671_v23 = vld [vmem:[%s1483_s13 + $0x70] sm:$0xff]  ;;  %v670_v24 = vld [vmem:[%s1483_s13 + $0x68] sm:$0xff]  ;;  %vm673_vm2 = vcmask 523264   ;;  %v1348_v40 = vmov 0.0   ;;  %s1135_s15 = sshll.u32 (%p1441_p9), %s1332_s20, 7 }
 0x13c   : > { %738 = vmatprep.subr.mxu0 %v672_v22  ;;  %1180 = vmatprep.subr.mxu1 %v672_v22  ;;  %v669_v25 = vld [vmem:[%s1483_s13 + $0x60] sm:$0xff]  ;;  %v668_v26 = vld [vmem:[%s1483_s13 + $0x58] sm:$0xff]  ;;  %v667_v27 = vld [vmem:[%s1483_s13 + $0x50] sm:$0xff] }
 0x13d   : > { %739 = vmatpush1.msra.mxu0 %v671_v23  ;;  %1188 = vmatpush1.msra.mxu1 %v671_v23  ;;  %v666_v28 = vld [vmem:[%s1483_s13 + $0x48] sm:$0xff]  ;;  %v665_v29 = vld [vmem:[%s1483_s13 + $0x40] sm:$0xff]  ;;  %v664_v30 = vld [vmem:[%s1483_s13 + $0x38] sm:$0xff] }
 0x13e   : > { %740 = vmatprep.subr.mxu0 %v670_v24  ;;  %1181 = vmatprep.subr.mxu1 %v670_v24  ;;  %v663_v31 = vld [vmem:[%s1483_s13 + $0x30] sm:$0xff]  ;;  %v662_v32 = vld [vmem:[%s1483_s13 + $0x28] sm:$0xff]  ;;  %v661_v33 = vld [vmem:[%s1483_s13 + $0x20] sm:$0xff] }
 0x13f   : > { %741 = vmatpush1.msra.mxu0 %v669_v25  ;;  %1189 = vmatpush1.msra.mxu1 %v669_v25  ;;  %v660_v34 = vld [vmem:[%s1483_s13 + $0x18] sm:$0xff]  ;;  %v659_v35 = vld [vmem:[%s1483_s13 + $0x10] sm:$0xff]  ;;  %v658_v36 = vld [vmem:[%s1483_s13 + $0x8] sm:$0xff] }
 0x140   : > { %742 = vmatprep.subr.mxu0 %v668_v26  ;;  %1182 = vmatprep.subr.mxu1 %v668_v26  ;;  %v657_v37 = vld [vmem:[%s1483_s13] sm:$0xff]  ;;  %v642_v41 = vld [vmem:[#allocation2 + $0x8] sm:$0xff]  ;;  %v643_v43 = vld [vmem:[#allocation2 + $0x10] sm:$0xff]  ;;  %s1134_s13 = sshll.u32 (%p1441_p9), %s1328_s19, 1 }
 0x141   : > { %743 = vmatpush1.msra.mxu0 %v667_v27  ;;  %1190 = vmatpush1.msra.mxu1 %v667_v27  ;;  %v641_v38 = vld [vmem:[#allocation2] sm:$0xff]  ;;  %v650_v42 = vld [vmem:[#allocation2 + $0x48] sm:$0xff]  ;;  %v651_v44 = vld [vmem:[#allocation2 + $0x50] sm:$0xff]  ;;  %s924_s7 = sadd.s32 (%p1441_p9), %s1135_s15, %s1134_s13 }
 0x142   : > { %744 = vmatprep.subr.mxu0 %v666_v28  ;;  %1183 = vmatprep.subr.mxu1 %v666_v28  ;;  %v649_v39 = vld [vmem:[#allocation2 + $0x40] sm:$0xff]  ;;  %v644_v45 = vld [vmem:[#allocation2 + $0x18] sm:$0xff]  ;;  %v646_v49 = vld [vmem:[#allocation2 + $0x28] sm:$0xff]  ;;  %s1136_s17 = sshll.u32 (%p1441_p9), %s924_s7, 3 }
 0x143   : > { %745 = vmatpush1.msra.mxu0 %v665_v29  ;;  %1191 = vmatpush1.msra.mxu1 %v665_v29  ;;  %v652_v46 = vld [vmem:[#allocation2 + $0x58] sm:$0xff]  ;;  %v645_v47 = vld [vmem:[#allocation2 + $0x20] sm:$0xff]  ;;  %v654_v50 = vld [vmem:[#allocation2 + $0x68] sm:$0xff]  ;;  %s1807_s28 = scalar_lea.vmem (%p1441_p9), %s1895_s4, %s1136_s17 }
 0x144   : > { %746 = vmatprep.subr.mxu0 %v664_v30  ;;  %1184 = vmatprep.subr.mxu1 %v664_v30  ;;  %v653_v48 = vld [vmem:[#allocation2 + $0x60] sm:$0xff]  ;;  %v647_v51 = vld [vmem:[#allocation2 + $0x30] sm:$0xff]  ;;  %v648_v53 = vld [vmem:[#allocation2 + $0x38] sm:$0xff] }
 0x145   : > { %747 = vmatpush1.msra.mxu0 %v663_v31  ;;  %1192 = vmatpush1.msra.mxu1 %v663_v31  ;;  %v655_v52 = vld [vmem:[#allocation2 + $0x70] sm:$0xff]  ;;  %v656_v54 = vld [vmem:[#allocation2 + $0x78] sm:$0xff] }
 0x146   : > { %748 = vmatprep.subr.mxu0 %v662_v32  ;;  %1185 = vmatprep.subr.mxu1 %v662_v32 }
 0x147   : > { %749 = vmatpush1.msra.mxu0 %v661_v33  ;;  %1193 = vmatpush1.msra.mxu1 %v661_v33 }
 0x148   : > { %750 = vmatprep.subr.mxu0 %v660_v34  ;;  %1186 = vmatprep.subr.mxu1 %v660_v34 }
 0x149   : > { %751 = vmatpush1.msra.mxu0 %v659_v35  ;;  %1194 = vmatpush1.msra.mxu1 %v659_v35 }
 0x14a   : > { %752 = vmatprep.subr.mxu0 %v658_v36  ;;  %1187 = vmatprep.subr.mxu1 %v658_v36 }
 0x14b   : > { %753 = vmatpush1.msra.mxu0 %v657_v37  ;;  %1195 = vmatpush1.msra.mxu1 %v657_v37 }
 0x14c   : > { %786 = vmatprep.mubr.f32.mxu0 %v1348_v40  ;;  %834 = vmatprep.mubr.f32.mxu1 %v1348_v40 }
 0x14d   : > { %1117 = vmatmul.mubr.msk.f32.vlgmr.msra.gmra.mxu0 %vm673_vm2, %v641_v38  ;;  %1125 = vmatmul.mubr.msk.f32.vlgmr.msra.gmra.mxu1 %vm673_vm2, %v649_v39 }
 0x14e   : > { %792 = vmatprep.mubr.f32.mxu0 %v1348_v40  ;;  %840 = vmatprep.mubr.f32.mxu1 %v1348_v40 }
 0x151   : > { %1118 = vmatmul.mubr.msk.f32.gmra.mxu0 %vm673_vm2, %v642_v41  ;;  %1126 = vmatmul.mubr.msk.f32.gmra.mxu1 %vm673_vm2, %v650_v42 }
 0x152   : > { %798 = vmatprep.mubr.f32.mxu0 %v1348_v40  ;;  %846 = vmatprep.mubr.f32.mxu1 %v1348_v40 }
 0x155   : > { %1119 = vmatmul.mubr.msk.f32.gmra.mxu0 %vm673_vm2, %v643_v43  ;;  %1127 = vmatmul.mubr.msk.f32.gmra.mxu1 %vm673_vm2, %v651_v44 }
 0x156   : > { %804 = vmatprep.mubr.f32.mxu0 %v1348_v40  ;;  %852 = vmatprep.mubr.f32.mxu1 %v1348_v40 }
 0x159   : > { %1120 = vmatmul.mubr.msk.f32.gmra.mxu0 %vm673_vm2, %v644_v45  ;;  %1128 = vmatmul.mubr.msk.f32.gmra.mxu1 %vm673_vm2, %v652_v46 }
 0x15a   : > { %810 = vmatprep.mubr.f32.mxu0 %v1348_v40  ;;  %858 = vmatprep.mubr.f32.mxu1 %v1348_v40 }
 0x15d   : > { %1121 = vmatmul.mubr.msk.f32.gmra.mxu0 %vm673_vm2, %v645_v47  ;;  %1129 = vmatmul.mubr.msk.f32.gmra.mxu1 %vm673_vm2, %v653_v48 }
 0x15e   : > { %816 = vmatprep.mubr.f32.mxu0 %v1348_v40  ;;  %864 = vmatprep.mubr.f32.mxu1 %v1348_v40 }
 0x161   : > { %1122 = vmatmul.mubr.msk.f32.gmra.mxu0 %vm673_vm2, %v646_v49  ;;  %1130 = vmatmul.mubr.msk.f32.gmra.mxu1 %vm673_vm2, %v654_v50 }
 0x162   : > { %822 = vmatprep.mubr.f32.mxu0 %v1348_v40  ;;  %870 = vmatprep.mubr.f32.mxu1 %v1348_v40 }
 0x165   : > { %1123 = vmatmul.mubr.msk.f32.gmra.mxu0 %vm673_vm2, %v647_v51  ;;  %1131 = vmatmul.mubr.msk.f32.gmra.mxu1 %vm673_vm2, %v655_v52 }
 0x166   : > { %828 = vmatprep.mubr.f32.mxu0 %v1348_v40  ;;  %876 = vmatprep.mubr.f32.mxu1 %v1348_v40 }
 0x169   : > { %1124 = vmatmul.mubr.msk.f32.gmra.mxu0 %vm673_vm2, %v648_v53  ;;  %1132 = vmatmul.mubr.msk.f32.gmra.mxu1 %vm673_vm2, %v656_v54 }
 0x20d   : > { %v788_v55 = vpop.f32.mrf.mxu0  ;;  %v836_v56 = vpop.f32.mrf.mxu1 }
 0x20e   : > { %883 = vst [vmem:[%s1485_s14] sm:$0xff] %v788_v55  ;;  %899 = vst [vmem:[%s1485_s14 + $0x80] sm:$0xff] %v836_v56 }
 0x20f   : > { %v790_v57 = vpop.f32.mrf.mxu0  ;;  %v838_v58 = vpop.f32.mrf.mxu1 }
 0x210   : > { %884 = vst [vmem:[%s1485_s14 + $0x8] sm:$0xff] %v790_v57  ;;  %900 = vst [vmem:[%s1485_s14 + $0x88] sm:$0xff] %v838_v58 }
 0x211   : > { %v794_v59 = vpop.f32.mrf.mxu0  ;;  %v842_v60 = vpop.f32.mrf.mxu1 }
 0x212   : > { %885 = vst [vmem:[%s1485_s14 + $0x10] sm:$0xff] %v794_v59  ;;  %901 = vst [vmem:[%s1485_s14 + $0x90] sm:$0xff] %v842_v60 }
 0x213   : > { %v796_v61 = vpop.f32.mrf.mxu0  ;;  %v844_v62 = vpop.f32.mrf.mxu1 }
 0x214   : > { %886 = vst [vmem:[%s1485_s14 + $0x18] sm:$0xff] %v796_v61  ;;  %902 = vst [vmem:[%s1485_s14 + $0x98] sm:$0xff] %v844_v62 }
 0x215   : > { %v800_v63 = vpop.f32.mrf.mxu0  ;;  %v848_v0 = vpop.f32.mrf.mxu1  ;;  %v939_v23 = vld [vmem:[%s1485_s14] sm:$0xff] (%p1441_p9) }
 0x216   : > { %887 = vst [vmem:[%s1485_s14 + $0x20] sm:$0xff] %v800_v63  ;;  %903 = vst [vmem:[%s1485_s14 + $0xa0] sm:$0xff] %v848_v0  ;;  %v971_v39 = vld [vmem:[%s1485_s14 + $0x80] sm:$0xff] (%p1441_p9) }
 0x217   : > { %v802_v1 = vpop.f32.mrf.mxu0  ;;  %v850_v2 = vpop.f32.mrf.mxu1  ;;  %v941_v24 = vld [vmem:[%s1485_s14 + $0x8] sm:$0xff] (%p1441_p9)  ;;  %940 = vst [vmem:[%s1807_s28] sm:$0xff] (%p1441_p9), %v939_v23  ;;  %972 = vst [vmem:[%s1807_s28 + $0x200] sm:$0xff] (%p1441_p9), %v971_v39 }
 0x218   : > { %888 = vst [vmem:[%s1485_s14 + $0x28] sm:$0xff] %v802_v1  ;;  %904 = vst [vmem:[%s1485_s14 + $0xa8] sm:$0xff] %v850_v2  ;;  %v973_v40 = vld [vmem:[%s1485_s14 + $0x88] sm:$0xff] (%p1441_p9) }
 0x219   : > { %v806_v3 = vpop.f32.mrf.mxu0  ;;  %v854_v4 = vpop.f32.mrf.mxu1  ;;  %v943_v25 = vld [vmem:[%s1485_s14 + $0x10] sm:$0xff] (%p1441_p9)  ;;  %942 = vst [vmem:[%s1807_s28 + $0x8] sm:$0xff] (%p1441_p9), %v941_v24  ;;  %974 = vst [vmem:[%s1807_s28 + $0x208] sm:$0xff] (%p1441_p9), %v973_v40 }
 0x21a   : > { %889 = vst [vmem:[%s1485_s14 + $0x30] sm:$0xff] %v806_v3  ;;  %905 = vst [vmem:[%s1485_s14 + $0xb0] sm:$0xff] %v854_v4  ;;  %v975_v41 = vld [vmem:[%s1485_s14 + $0x90] sm:$0xff] (%p1441_p9) }
 0x21b   : > { %v808_v5 = vpop.f32.mrf.mxu0  ;;  %v856_v6 = vpop.f32.mrf.mxu1  ;;  %v945_v26 = vld [vmem:[%s1485_s14 + $0x18] sm:$0xff] (%p1441_p9)  ;;  %944 = vst [vmem:[%s1807_s28 + $0x40] sm:$0xff] (%p1441_p9), %v943_v25  ;;  %976 = vst [vmem:[%s1807_s28 + $0x240] sm:$0xff] (%p1441_p9), %v975_v41 }
 0x21c   : > { %890 = vst [vmem:[%s1485_s14 + $0x38] sm:$0xff] %v808_v5  ;;  %906 = vst [vmem:[%s1485_s14 + $0xb8] sm:$0xff] %v856_v6  ;;  %v977_v42 = vld [vmem:[%s1485_s14 + $0x98] sm:$0xff] (%p1441_p9) }
 0x21d   : > { %v812_v7 = vpop.f32.mrf.mxu0  ;;  %v860_v8 = vpop.f32.mrf.mxu1  ;;  %v947_v27 = vld [vmem:[%s1485_s14 + $0x20] sm:$0xff] (%p1441_p9)  ;;  %946 = vst [vmem:[%s1807_s28 + $0x48] sm:$0xff] (%p1441_p9), %v945_v26  ;;  %978 = vst [vmem:[%s1807_s28 + $0x248] sm:$0xff] (%p1441_p9), %v977_v42 }
 0x21e   : > { %891 = vst [vmem:[%s1485_s14 + $0x40] sm:$0xff] %v812_v7  ;;  %907 = vst [vmem:[%s1485_s14 + $0xc0] sm:$0xff] %v860_v8  ;;  %v979_v43 = vld [vmem:[%s1485_s14 + $0xa0] sm:$0xff] (%p1441_p9) }
 0x21f   : > { %v814_v9 = vpop.f32.mrf.mxu0  ;;  %v862_v10 = vpop.f32.mrf.mxu1  ;;  %v949_v28 = vld [vmem:[%s1485_s14 + $0x28] sm:$0xff] (%p1441_p9)  ;;  %948 = vst [vmem:[%s1807_s28 + $0x80] sm:$0xff] (%p1441_p9), %v947_v27  ;;  %980 = vst [vmem:[%s1807_s28 + $0x280] sm:$0xff] (%p1441_p9), %v979_v43 }
 0x220   : > { %892 = vst [vmem:[%s1485_s14 + $0x48] sm:$0xff] %v814_v9  ;;  %908 = vst [vmem:[%s1485_s14 + $0xc8] sm:$0xff] %v862_v10  ;;  %v981_v44 = vld [vmem:[%s1485_s14 + $0xa8] sm:$0xff] (%p1441_p9) }
 0x221   : > { %v818_v11 = vpop.f32.mrf.mxu0  ;;  %v866_v12 = vpop.f32.mrf.mxu1  ;;  %v951_v29 = vld [vmem:[%s1485_s14 + $0x30] sm:$0xff] (%p1441_p9)  ;;  %950 = vst [vmem:[%s1807_s28 + $0x88] sm:$0xff] (%p1441_p9), %v949_v28  ;;  %982 = vst [vmem:[%s1807_s28 + $0x288] sm:$0xff] (%p1441_p9), %v981_v44 }
 0x222   : > { %893 = vst [vmem:[%s1485_s14 + $0x50] sm:$0xff] %v818_v11  ;;  %909 = vst [vmem:[%s1485_s14 + $0xd0] sm:$0xff] %v866_v12  ;;  %v983_v45 = vld [vmem:[%s1485_s14 + $0xb0] sm:$0xff] (%p1441_p9) }
 0x223   : > { %v820_v13 = vpop.f32.mrf.mxu0  ;;  %v868_v14 = vpop.f32.mrf.mxu1  ;;  %v953_v30 = vld [vmem:[%s1485_s14 + $0x38] sm:$0xff] (%p1441_p9)  ;;  %952 = vst [vmem:[%s1807_s28 + $0xc0] sm:$0xff] (%p1441_p9), %v951_v29  ;;  %984 = vst [vmem:[%s1807_s28 + $0x2c0] sm:$0xff] (%p1441_p9), %v983_v45 }
 0x224   : > { %894 = vst [vmem:[%s1485_s14 + $0x58] sm:$0xff] %v820_v13  ;;  %910 = vst [vmem:[%s1485_s14 + $0xd8] sm:$0xff] %v868_v14  ;;  %v985_v46 = vld [vmem:[%s1485_s14 + $0xb8] sm:$0xff] (%p1441_p9) }
 0x225   : > { %v824_v15 = vpop.f32.mrf.mxu0  ;;  %v872_v16 = vpop.f32.mrf.mxu1  ;;  %v955_v31 = vld [vmem:[%s1485_s14 + $0x40] sm:$0xff] (%p1441_p9)  ;;  %954 = vst [vmem:[%s1807_s28 + $0xc8] sm:$0xff] (%p1441_p9), %v953_v30  ;;  %986 = vst [vmem:[%s1807_s28 + $0x2c8] sm:$0xff] (%p1441_p9), %v985_v46 }
 0x226   : > { %895 = vst [vmem:[%s1485_s14 + $0x60] sm:$0xff] %v824_v15  ;;  %911 = vst [vmem:[%s1485_s14 + $0xe0] sm:$0xff] %v872_v16  ;;  %v987_v47 = vld [vmem:[%s1485_s14 + $0xc0] sm:$0xff] (%p1441_p9) }
 0x227   : > { %v826_v17 = vpop.f32.mrf.mxu0  ;;  %v874_v18 = vpop.f32.mrf.mxu1  ;;  %v957_v32 = vld [vmem:[%s1485_s14 + $0x48] sm:$0xff] (%p1441_p9)  ;;  %956 = vst [vmem:[%s1807_s28 + $0x100] sm:$0xff] (%p1441_p9), %v955_v31  ;;  %988 = vst [vmem:[%s1807_s28 + $0x300] sm:$0xff] (%p1441_p9), %v987_v47 }
 0x228   : > { %896 = vst [vmem:[%s1485_s14 + $0x68] sm:$0xff] %v826_v17  ;;  %912 = vst [vmem:[%s1485_s14 + $0xe8] sm:$0xff] %v874_v18  ;;  %921 = sbr.rel (!%p1441_p9) target bundleno = 566 (0x236), region = 67  ;;  %v989_v48 = vld [vmem:[%s1485_s14 + $0xc8] sm:$0xff] (%p1441_p9) }
 0x229   : > { %v830_v19 = vpop.f32.mrf.mxu0  ;;  %v878_v20 = vpop.f32.mrf.mxu1  ;;  %v959_v33 = vld [vmem:[%s1485_s14 + $0x50] sm:$0xff] (%p1441_p9)  ;;  %958 = vst [vmem:[%s1807_s28 + $0x108] sm:$0xff] (%p1441_p9), %v957_v32  ;;  %990 = vst [vmem:[%s1807_s28 + $0x308] sm:$0xff] (%p1441_p9), %v989_v48 }
 0x22a   : > { %897 = vst [vmem:[%s1485_s14 + $0x70] sm:$0xff] %v830_v19  ;;  %913 = vst [vmem:[%s1485_s14 + $0xf0] sm:$0xff] %v878_v20  ;;  %v991_v49 = vld [vmem:[%s1485_s14 + $0xd0] sm:$0xff] (%p1441_p9) }
 0x22b   : > { %v832_v21 = vpop.f32.mrf.mxu0  ;;  %v880_v22 = vpop.f32.mrf.mxu1  ;;  %v961_v34 = vld [vmem:[%s1485_s14 + $0x58] sm:$0xff] (%p1441_p9)  ;;  %960 = vst [vmem:[%s1807_s28 + $0x140] sm:$0xff] (%p1441_p9), %v959_v33  ;;  %992 = vst [vmem:[%s1807_s28 + $0x340] sm:$0xff] (%p1441_p9), %v991_v49 }
 0x22c   : > { %898 = vst [vmem:[%s1485_s14 + $0x78] sm:$0xff] %v832_v21  ;;  %914 = vst [vmem:[%s1485_s14 + $0xf8] sm:$0xff] %v880_v22  ;;  %v993_v50 = vld [vmem:[%s1485_s14 + $0xd8] sm:$0xff] (%p1441_p9) }
 0x22d   : > { %962 = vst [vmem:[%s1807_s28 + $0x148] sm:$0xff] %v961_v34  ;;  %v963_v35 = vld [vmem:[%s1485_s14 + $0x60] sm:$0xff]  ;;  %994 = vst [vmem:[%s1807_s28 + $0x348] sm:$0xff] %v993_v50 }
 0x22e   : > { %964 = vst [vmem:[%s1807_s28 + $0x180] sm:$0xff] %v963_v35  ;;  %v995_v51 = vld [vmem:[%s1485_s14 + $0xe0] sm:$0xff] }
 0x22f   : > { %v965_v36 = vld [vmem:[%s1485_s14 + $0x68] sm:$0xff]  ;;  %996 = vst [vmem:[%s1807_s28 + $0x380] sm:$0xff] %v995_v51 }
 0x230   : > { %966 = vst [vmem:[%s1807_s28 + $0x188] sm:$0xff] %v965_v36  ;;  %v997_v52 = vld [vmem:[%s1485_s14 + $0xe8] sm:$0xff] }
 0x231   : > { %v967_v37 = vld [vmem:[%s1485_s14 + $0x70] sm:$0xff]  ;;  %998 = vst [vmem:[%s1807_s28 + $0x388] sm:$0xff] %v997_v52 }
 0x232   : > { %968 = vst [vmem:[%s1807_s28 + $0x1c0] sm:$0xff] %v967_v37  ;;  %v999_v53 = vld [vmem:[%s1485_s14 + $0xf0] sm:$0xff] }
 0x233   : > { %v969_v38 = vld [vmem:[%s1485_s14 + $0x78] sm:$0xff]  ;;  %1000 = vst [vmem:[%s1807_s28 + $0x3c0] sm:$0xff] %v999_v53 }
 0x234   : > { %970 = vst [vmem:[%s1807_s28 + $0x1c8] sm:$0xff] %v969_v38  ;;  %v1001_v54 = vld [vmem:[%s1485_s14 + $0xf8] sm:$0xff] }
 0x235   : > { %1002 = vst [vmem:[%s1807_s28 + $0x3c8] sm:$0xff] %v1001_v54 }
 0x236 PF: > { %s14_s23 = sadd.s32 1, %s1344_s23   ;;  %s1897_s15 = smov %s1316_s16 }
 0x237   : > { %p11_p2 = scmp.ge.s32.totalorder %s14_s23, 10   ;;  %s1898_s16 = smov %s1446_s8 }
 0x238   : > { %s1899_s17 = smov %s1324_s18  ;;  %s1900_s18 = smov %s1435_s30 }
 0x239   : > { %s1901_s19 = smov %s1336_s21  ;;  %s1902_s20 = smov %s1340_s22 }
 0x23a   : > { %s1903_s21 = smov %s1906_s25  ;;  %s1904_s22 = smov %s1910_s26 }
 0x23b   :  { %13 = sbr.rel (!%p11_p2) target bundleno = 5 (0x5), region = 124 }

</bundles_post_ra>
